<compile_context>
chip_gen: v6e
topology: v6e:2x2x1
jax: 0.10.0
libtpu: 0.0.40
codegen_flags: <defaults>
</compile_context>

<pallas_src>
import math
import functools

import jax
import jax.numpy as jnp
from jax.experimental import pallas as pl
from jax.experimental.pallas import tpu as pltpu

_LANE = 128                 # lane width: every load/store is a full-lane vld/vst
_MIN_PALLAS_ELEMS = 1024    # below this a standalone pallas_call is pure overhead
_GAIN = math.sqrt(2.0)


def _scaled_leaky_relu_kernel(x_ref, o_ref, *, negative_slope, gain):
    # Compute in f32 (exact for f32 inputs, better rounding for bf16), with the
    # gain folded into the select: one select + one vmul per vreg.
    x = x_ref[...].astype(jnp.float32)
    y = x * jnp.where(x >= 0, gain, gain * negative_slope)
    o_ref[...] = y.astype(o_ref.dtype)


def _sublane(dtype) -> int:
    # Native sublane packing granularity: 8 (4-byte), 16 (2-byte), 32 (1-byte).
    return max(8, 32 // jnp.dtype(dtype).itemsize)


def _per_buffer_block_bytes() -> int:
    # Generation-aware block budget (in + out, each double-buffered -> 4x this).
    try:
        vmem = int(pltpu.get_tpu_info().vmem_capacity_bytes)
    except Exception:
        return 2 << 20
    # 64 MiB physical VMEM => v7x-class: bigger blocks to feed ~3.2 TB/s HBM.
    return (4 << 20) if vmem <= (64 << 20) else (2 << 20)


def _run_pallas(x2d, negative_slope):
    rows, lane = x2d.shape
    dtype = x2d.dtype
    itemsize = jnp.dtype(dtype).itemsize
    sub = _sublane(dtype)

    budget_rows = _per_buffer_block_bytes() // (lane * itemsize)
    budget_rows = max(sub, (budget_rows // sub) * sub)
    if rows <= sub:
        block_rows = rows                                   # full-dim block (always legal)
    else:
        block_rows = min(budget_rows, (rows // sub) * sub)  # sublane-aligned, <= rows

    grid = (pl.cdiv(rows, block_rows),)  # partial last block handled by Pallas

    kernel = functools.partial(
        _scaled_leaky_relu_kernel,
        negative_slope=float(negative_slope),
        gain=_GAIN,
    )
    return pl.pallas_call(
        kernel,
        out_shape=jax.ShapeDtypeStruct((rows, lane), dtype),
        grid_spec=pltpu.PrefetchScalarGridSpec(
            num_scalar_prefetch=0,
            grid=grid,
            in_specs=[pl.BlockSpec((block_rows, lane), lambda i: (i, 0))],
            out_specs=pl.BlockSpec((block_rows, lane), lambda i: (i, 0)),
        ),
        compiler_params=pltpu.CompilerParams(
            dimension_semantics=("parallel",),  # independent tiles -> 2 TCs on v7x
        ),
    )(x2d)


def _jax_fallback(x, negative_slope):
    x32 = x.astype(jnp.float32)
    y = x32 * jnp.where(x32 >= 0, _GAIN, _GAIN * float(negative_slope))
    return y.astype(x.dtype)


def scaled_leaky_relu(x, negative_slope=0.2):
    """sqrt(2) * leaky_relu(x, negative_slope), any shape / layout."""
    n = x.size
    if n == 0 or n < _MIN_PALLAS_ELEMS:
        # Launch + layout glue would dominate; let XLA fuse the tiny op instead.
        return _jax_fallback(x, negative_slope)

    xf = x.reshape(-1)
    n_aligned = (n // _LANE) * _LANE
    if n_aligned == n:
        # Zero-copy fast path: flat -> (rows, 128) is a bitcast; no pad / slice.
        out = _run_pallas(xf.reshape(-1, _LANE), negative_slope)
        return out.reshape(x.shape)

    # Ragged: kernel on the 128-aligned prefix, <128-element tail in plain JAX
    # (avoids multi-MiB zero padding of the input and slicing of the output).
    head = _run_pallas(xf[:n_aligned].reshape(-1, _LANE), negative_slope)
    tail = _jax_fallback(xf[n_aligned:], negative_slope)
    return jnp.concatenate([head.reshape(-1), tail]).reshape(x.shape)


def ref_scaled_leaky_relu(x, negative_slope=0.2):
    """Pure-JAX reference mirroring the PyTorch module."""
    return jnp.where(x >= 0, x, x * negative_slope) * math.sqrt(2.0)


if __name__ == "__main__":
    # NCHW activation shape consistent with the module's usage.
    x = jax.random.normal(jax.random.PRNGKey(0), (2, 4, 16, 16), jnp.float32)

    out = jax.block_until_ready(scaled_leaky_relu(x, negative_slope=0.2))
    ref = ref_scaled_leaky_relu(x, negative_slope=0.2)
    assert out.shape == x.shape and out.dtype == x.dtype
    assert jnp.allclose(out, ref, rtol=1e-5, atol=1e-5), float(jnp.max(jnp.abs(out - ref)))

    # Ragged size above the threshold: exercises aligned-prefix kernel + JAX tail.
    x2 = jax.random.normal(jax.random.PRNGKey(1), (5, 7, 33), jnp.float32)  # 1155 elems
    out2 = jax.block_until_ready(scaled_leaky_relu(x2))
    assert jnp.allclose(out2, ref_scaled_leaky_relu(x2), rtol=1e-5, atol=1e-5)

    # Tiny input: pure-JAX fallback path.
    x3 = jax.random.normal(jax.random.PRNGKey(2), (3, 5, 7), jnp.float32)
    out3 = jax.block_until_ready(scaled_leaky_relu(x3))
    assert jnp.allclose(out3, ref_scaled_leaky_relu(x3), rtol=1e-5, atol=1e-5)

    print("KERNEL_OK")
</pallas_src>

<mosaic_0001>
module attributes {stable_mosaic.version = 11 : i64} {
  func.func @_scaled_leaky_relu_kernel(%arg0: i32, %arg1: memref<16x128xf32, #tpu.memory_space<vmem>>, %arg2: memref<16x128xf32, #tpu.memory_space<vmem>>) attributes {dimension_semantics = [#tpu.dimension_semantics<parallel>], iteration_bounds = array<i64: 1>, scalar_prefetch = 0 : i64, scratch_operands = 0 : i64, tpu.core_type = #tpu.core_type<tc>, window_params = [{transform_indices = @transform_0, window_bounds = array<i64: 16, 128>}, {transform_indices = @transform_1, window_bounds = array<i64: 16, 128>}]} {
    %c0 = arith.constant 0 : index
    %c0_0 = arith.constant 0 : index
    %0 = vector.load %arg1[%c0, %c0_0] : memref<16x128xf32, #tpu.memory_space<vmem>>, vector<16x128xf32>
    %cst = arith.constant 0.000000e+00 : f32
    %1 = vector.broadcast %cst : f32 to vector<16x128xf32>
    %2 = arith.cmpf oge, %0, %1 : vector<16x128xf32>
    %cst_1 = arith.constant 1.41421354 : f32
    %cst_2 = arith.constant 0.282842726 : f32
    %3 = vector.broadcast %cst_1 : f32 to vector<16x128xf32>
    %4 = vector.broadcast %cst_2 : f32 to vector<16x128xf32>
    %5 = arith.select %2, %3, %4 : vector<16x128xi1>, vector<16x128xf32>
    %6 = arith.mulf %0, %5 : vector<16x128xf32>
    %c0_3 = arith.constant 0 : index
    %c0_4 = arith.constant 0 : index
    %7 = vector.load %arg2[%c0_3, %c0_4] : memref<16x128xf32, #tpu.memory_space<vmem>>, vector<16x128xf32>
    tpu.vector_store %arg2[%c0_3, %c0_4], %6 {strides = array<i32>} : memref<16x128xf32, #tpu.memory_space<vmem>>, vector<16x128xf32>,
    return
  }
  func.func @transform_0(%arg0: i32) -> (i32, i32) {
    %c0_i32 = arith.constant 0 : i32
    %c0_i32_0 = arith.constant 0 : i32
    return %arg0, %c0_i32 : i32, i32
  }
  func.func @transform_1(%arg0: i32) -> (i32, i32) {
    %c0_i32 = arith.constant 0 : i32
    %c0_i32_0 = arith.constant 0 : i32
    return %arg0, %c0_i32 : i32, i32
  }
}

</mosaic_0001>

<bundles_post_ra>
// kernel: tpu_custom_call.1
= control target key start
LH: loop header
LB: loop body
LE: loop exit
PB: predicated region body
PF: predicated region fallthrough
CT: control target
= control target key end

     0   :  { %6 = vsyncpa [#allocation3], 0  ;;  %s120_s0 = inlined_call_operand.hbm [shape: f32[16,128], index: 0, kind: input, shape index: {}]   ;;  %s121_s1 = inlined_call_operand.hbm [shape: f32[16,128], index: 1, kind: output, shape index: {}]  }
   0x1   :  { %7 = vsyncpa [#allocation4], 0  ;;  %s99_s6 = smov [#allocation2]  }
   0x2   :  { %s13_s7 = sshll.u32 %s99_s6, 4  ;;  %s14_s7 = int_to_ptr.vmem [resolvable:$true] %s13_s7 }
   0x3   :  { %s63_s8 = scalar_lea.vmem %s14_s7, 256  ;;  %p68_p1 = scmp.lt.s32.totalorder %s14_s7, %s14_s7 }
   0x4   :  { %p64_p0 = scmp.ne.s32.totalorder %s14_s7, %s63_s8  ;;  %p69_p2 = scmp.lt.s32.totalorder %s63_s8, %s63_s8 }
   0x6   :  { %p70_p3 = por %p69_p2, %p68_p1 }
   0x8   :  { %p71_p4 = pnand %p70_p3, %p64_p0 }
   0xa   :  { %74 = shalt.err (!%p71_p4)
}
   0xb   :  { %s100_s9 = smov 128   ;;  %s101_s10 = smov 8  }
   0xc   :  { %19 = dma.hbm_to_vmem [thread:$0]  %s120_s0, 256, %s14_s7, [#allocation3], %s100_s9, %s100_s9, %s101_s10  }
   0xd   :  { %95 = dma.done.wait [#allocation3], 256  }
   0xe   :  { %96 = vsyncadd [#allocation3], 4294967040  ;;  %v23_v0 = vld [vmem:[#allocation2] sm:$0xff]  ;;  %v24_v1 = vld [vmem:[#allocation2 + $0x8] sm:$0xff]  ;;  %s102_s13 = smov [#allocation5]  }
   0xf   :  { %s38_s14 = sshll.u32 %s102_s13, 4  ;;  %vm25_vm0 = vcmp.ge.f32.partialorder %v23_v0, 0.0  ;;  %vm26_vm1 = vcmp.ge.f32.partialorder %v24_v1, 0.0  ;;  %v103_v2 = vmov 0.28284273   ;;  %s39_s14 = int_to_ptr.vmem [resolvable:$true] %s38_s14 }
  0x10   :  { %v27_v3 = vsel %vm25_vm0, 1.4142135, %v103_v2  ;;  %v28_v4 = vsel %vm26_vm1, 1.4142135, %v103_v2  ;;  %s75_s15 = scalar_lea.vmem %s39_s14, 256  ;;  %p80_p6 = scmp.lt.s32.totalorder %s39_s14, %s39_s14 }
  0x11   :  { %v29_v5 = vmul.f32 %v27_v3, %v23_v0  ;;  %v30_v6 = vmul.f32 %v28_v4, %v24_v1  ;;  %p76_p5 = scmp.ne.s32.totalorder %s39_s14, %s75_s15  ;;  %p81_p7 = scmp.lt.s32.totalorder %s75_s15, %s75_s15 }
  0x13   :  { %31 = vst [vmem:[#allocation5] sm:$0xff] %v29_v5  ;;  %32 = vst [vmem:[#allocation5 + $0x8] sm:$0xff] %v30_v6  ;;  %p82_p8 = por %p81_p7, %p80_p6 }
  0x15   :  { %p83_p9 = pnand %p82_p8, %p76_p5 }
  0x17   :  { %86 = shalt.err (!%p83_p9)
}
  0x18   :  { %44 = dma.vmem_to_hbm [thread:$0]  %s39_s14, 256, %s121_s1, [#allocation4], %s100_s9, %s100_s9, %s101_s10  }
  0x19   :  { %97 = dma.done.wait [#allocation4], 256  }
  0x1a   :  { %98 = vsyncadd [#allocation4], 4294967040 }
  0x1b   :  { %48 = vsyncpa [#allocation3], 1 }
  0x1c   :  { %49 = vsyncpa [#allocation4], 1 }

</bundles_post_ra>
